<compile_context>
chip_gen: v5e
topology: v5e:2x2
jax: 0.10.0
libtpu: 0.0.40
codegen_flags: <defaults>
</compile_context>

<pallas_src>
import functools

import jax
import jax.numpy as jnp
from jax import lax
from jax.experimental import pallas as pl
from jax.experimental.pallas import tpu as pltpu


# ----------------------------------------------------------------------------
# Generation-aware sizing
# ----------------------------------------------------------------------------
def _chip_info():
    """Returns (vmem_budget_bytes, preferred_query_tile) for the attached TPU."""
    try:
        kind = jax.devices()[0].device_kind.lower()
    except Exception:
        kind = ""
    if "v5 lite" in kind or "v5e" in kind or "v5lite" in kind:
        vmem, tq = 128 << 20, 128          # v5e MXU is 4x128^2 -> 256-wide buys nothing
    elif "v6" in kind:
        vmem, tq = 128 << 20, 256
    elif "v7" in kind:
        vmem, tq = 64 << 20, 256           # v7x: only 64 MiB VMEM per TensorCore
    elif "v4" in kind:
        vmem, tq = 128 << 20, 128
    elif "v2" in kind or "v3" in kind:
        vmem, tq = 16 << 20, 128
    else:
        vmem, tq = 64 << 20, 256           # conservative default
    try:                                    # prefer exact number when queryable
        vmem = int(pltpu.get_tpu_info().vmem_capacity_bytes)
    except Exception:
        pass
    budget = int(vmem * 0.78)               # headroom for compiler scratch / spills
    return budget, tq


# ----------------------------------------------------------------------------
# Fused path: K/V cached in VMEM scratch, reused across query tiles
# ----------------------------------------------------------------------------
def _fused_kernel(x_ref, wq_ref, bq_ref, wk_ref, bk_ref, wv_ref, bv_ref,
                  o_ref, k_scr, v_scr, *, tq, num_q):
    qi = pl.program_id(1)
    Bt, S, D = x_ref.shape

    # K / V projections once per batch block; K is stored before V is computed so both
    # full (Bt*S, D) f32 results are never live simultaneously (peak-pressure step).
    @pl.when(qi == 0)
    def _project_kv():
        x2 = x_ref[...].reshape(Bt * S, D)                       # bf16 already
        k = jnp.dot(x2, wk_ref[...], preferred_element_type=jnp.float32) + bk_ref[...]
        k_scr[...] = k.reshape(Bt, S, D).astype(k_scr.dtype)
        v = jnp.dot(x2, wv_ref[...], preferred_element_type=jnp.float32) + bv_ref[...]
        v_scr[...] = v.reshape(Bt, S, D).astype(v_scr.dtype)

    # Q projection for this query tile (softmax scale pre-folded into wq/bq).
    if num_q == 1:
        xq = x_ref[...]
    else:
        start = pl.multiple_of(qi * tq, tq)
        xq = x_ref[:, pl.ds(start, tq), :]
    q = jnp.dot(xq.reshape(Bt * tq, D), wq_ref[...],
                preferred_element_type=jnp.float32) + bq_ref[...]

    if Bt == 1:
        # Canonical 2-D MXU shapes: (tq,D)x(S,D)^T and (tq,S)x(S,D); no size-1 batch dim.
        q2 = q.astype(jnp.bfloat16)
        k2 = k_scr[...].reshape(S, D)
        v2 = v_scr[...].reshape(S, D)
        s = lax.dot_general(q2, k2, (((1,), (1,)), ((), ())),
                            preferred_element_type=jnp.float32)   # (tq, S)
        p = jnp.exp(s - jnp.max(s, axis=-1, keepdims=True))
        w = p * pl.reciprocal(jnp.sum(p, axis=-1, keepdims=True), approx=True)
        out = jnp.dot(w.astype(jnp.bfloat16), v2, preferred_element_type=jnp.float32)
        o_ref[...] = out.reshape(1, tq, D).astype(o_ref.dtype)
    else:
        q3 = q.reshape(Bt, tq, D).astype(jnp.bfloat16)
        k3 = k_scr[...]
        v3 = v_scr[...]
        s = lax.dot_general(q3, k3, (((2,), (2,)), ((0,), (0,))),
                            preferred_element_type=jnp.float32)   # (Bt, tq, S)
        p = jnp.exp(s - jnp.max(s, axis=-1, keepdims=True))
        w = p * pl.reciprocal(jnp.sum(p, axis=-1, keepdims=True), approx=True)
        out = lax.dot_general(w.astype(jnp.bfloat16), v3, (((2,), (1,)), ((0,), (0,))),
                              preferred_element_type=jnp.float32)
        o_ref[...] = out.astype(o_ref.dtype)


def _fused_footprint(Bt, S, D, tq, out_bytes):
    bf16, f32 = 2, 4
    x_buf = 2 * Bt * S * D * bf16            # double-buffered bf16 x blocks
    kv_scr = 2 * Bt * S * D * bf16           # resident K / V VMEM caches
    weights = 3 * D * D * bf16 + 3 * D * f32
    out_buf = 2 * Bt * tq * D * out_bytes
    live = Bt * tq * S * f32 + 2 * Bt * tq * D * f32 + Bt * S * D * f32
    return x_buf + kv_scr + weights + out_buf + live


def _fused_attention(xb, wq, bq, wk, bk, wv, bv, out_dtype, *, Bt, tq, num_q, budget):
    B, S, D = xb.shape
    resident = pl.BlockSpec(memory_space=pltpu.MemorySpace.VMEM)
    x_spec = pl.BlockSpec((Bt, S, D), lambda bi, qi: (bi, 0, 0))
    o_spec = pl.BlockSpec((Bt, tq, D), lambda bi, qi: (bi, qi, 0))
    kernel = functools.partial(_fused_kernel, tq=tq, num_q=num_q)
    return pl.pallas_call(
        kernel,
        out_shape=jax.ShapeDtypeStruct((B, S, D), out_dtype),
        grid_spec=pltpu.PrefetchScalarGridSpec(
            num_scalar_prefetch=0,
            grid=(B // Bt, num_q),
            in_specs=[x_spec, resident, resident, resident, resident, resident, resident],
            out_specs=o_spec,
            scratch_shapes=[pltpu.VMEM((Bt, S, D), jnp.bfloat16),   # K cache
                            pltpu.VMEM((Bt, S, D), jnp.bfloat16)],  # V cache
        ),
        compiler_params=pltpu.CompilerParams(
            dimension_semantics=("parallel", "arbitrary"),
            vmem_limit_bytes=budget,
        ),
    )(xb, wq, bq, wk, bk, wv, bv)


# ----------------------------------------------------------------------------
# Flash path (large S): K/V projection prologue + online-softmax attention
# ----------------------------------------------------------------------------
def _kv_proj_kernel(x_ref, wk_ref, bk_ref, wv_ref, bv_ref, k_ref, v_ref):
    x2 = x_ref[0]                                                  # (tr, D) bf16
    k = jnp.dot(x2, wk_ref[...], preferred_element_type=jnp.float32) + bk_ref[...]
    k_ref[0] = k.astype(k_ref.dtype)                               # store K before V
    v = jnp.dot(x2, wv_ref[...], preferred_element_type=jnp.float32) + bv_ref[...]
    v_ref[0] = v.astype(v_ref.dtype)


def _project_kv(xb, wk, bk, wv, bv, *, budget):
    B, S, D = xb.shape
    tr = next((t for t in (512, 256, 128) if S % t == 0), S)
    resident = pl.BlockSpec(memory_space=pltpu.MemorySpace.VMEM)
    row_spec = pl.BlockSpec((1, tr, D), lambda b, r: (b, r, 0))
    kv_shape = jax.ShapeDtypeStruct((B, S, D), jnp.bfloat16)
    return pl.pallas_call(
        _kv_proj_kernel,
        out_shape=(kv_shape, kv_shape),
        grid_spec=pltpu.PrefetchScalarGridSpec(
            num_scalar_prefetch=0,
            grid=(B, S // tr),
            in_specs=[row_spec, resident, resident, resident, resident],
            out_specs=[row_spec, row_spec],
        ),
        compiler_params=pltpu.CompilerParams(
            dimension_semantics=("parallel", "parallel"),
            vmem_limit_bytes=budget,
        ),
    )(xb, wk, bk, wv, bv)


def _flash_kernel(x_ref, wq_ref, bq_ref, k_ref, v_ref, o_ref,
                  q_scr, m_scr, l_scr, acc_scr):
    ki = pl.program_id(2)

    @pl.when(ki == 0)
    def _init():
        xq = x_ref[0]                                              # (tq, D) bf16
        q = jnp.dot(xq, wq_ref[...], preferred_element_type=jnp.float32) + bq_ref[...]
        q_scr[...] = q.astype(q_scr.dtype)                         # scale pre-folded
        m_scr[...] = jnp.full_like(m_scr, -jnp.inf)
        l_scr[...] = jnp.zeros_like(l_scr)
        acc_scr[...] = jnp.zeros_like(acc_scr)

    q = q_scr[...]                                                 # (tq, D) bf16
    k = k_ref[0]                                                   # (tk, D) bf16
    v = v_ref[0]                                                   # (tk, D) bf16

    # scores[i, j] = sum_d q[i, d] * k[j, d] — K never transposed in VMEM.
    s = lax.dot_general(q, k, (((1,), (1,)), ((), ())),
                        preferred_element_type=jnp.float32)        # (tq, tk) f32

    m_prev = m_scr[...]
    m_new = jnp.maximum(m_prev, jnp.max(s, axis=-1, keepdims=True))
    alpha = jnp.exp(m_prev - m_new)
    p = jnp.exp(s - m_new)
    l_scr[...] = alpha * l_scr[...] + jnp.sum(p, axis=-1, keepdims=True)
    acc_scr[...] = alpha * acc_scr[...] + jnp.dot(
        p.astype(jnp.bfloat16), v, preferred_element_type=jnp.float32)
    m_scr[...] = m_new

    @pl.when(ki == pl.num_programs(2) - 1)
    def _finalize():
        inv = pl.reciprocal(l_scr[...], approx=True)               # EUP slot, ~free
        o_ref[0] = (acc_scr[...] * inv).astype(o_ref.dtype)


def _flash_attention(xb, wq, bq, k, v, out_dtype, *, tq_pref, budget):
    B, S, D = xb.shape
    tq = next((t for t in (tq_pref, 128) if S % t == 0), S)
    tk = next((t for t in (512, 256, 128) if S % t == 0), S)
    num_q, num_k = S // tq, S // tk
    resident = pl.BlockSpec(memory_space=pltpu.MemorySpace.VMEM)
    return pl.pallas_call(
        _flash_kernel,
        out_shape=jax.ShapeDtypeStruct((B, S, D), out_dtype),
        grid_spec=pltpu.PrefetchScalarGridSpec(
            num_scalar_prefetch=0,
            grid=(B, num_q, num_k),
            in_specs=[pl.BlockSpec((1, tq, D), lambda b, qi, ki: (b, qi, 0)),
                      resident, resident,
                      pl.BlockSpec((1, tk, D), lambda b, qi, ki: (b, ki, 0)),
                      pl.BlockSpec((1, tk, D), lambda b, qi, ki: (b, ki, 0))],
            out_specs=pl.BlockSpec((1, tq, D), lambda b, qi, ki: (b, qi, 0)),
            scratch_shapes=[pltpu.VMEM((tq, D), jnp.bfloat16),      # scaled Q tile
                            pltpu.VMEM((tq, 1), jnp.float32),       # running max
                            pltpu.VMEM((tq, 1), jnp.float32),       # running denom
                            pltpu.VMEM((tq, D), jnp.float32)],      # running accumulator
        ),
        compiler_params=pltpu.CompilerParams(
            dimension_semantics=("parallel", "parallel", "arbitrary"),
            vmem_limit_bytes=budget,
        ),
    )(xb, wq, bq, k, v)


# ----------------------------------------------------------------------------
# Public wrapper
# ----------------------------------------------------------------------------
def attention_block(x, wq, bq, wk, bk, wv, bv, *, out_dtype=None, force_flash=False):
    """x: (B, S, D); wq/wk/wv: (D_in, D_out) = torch weight transposed; b*: (1, D)."""
    B, S, D = x.shape
    out_dtype = x.dtype if out_dtype is None else out_dtype
    budget, tq_pref = _chip_info()
    scale = float(D) ** (-0.5)

    # Fold the softmax scale into the Q projection (f32 constant transform).
    wq = jnp.asarray(wq, jnp.float32) * scale
    bq = jnp.asarray(bq, jnp.float32) * scale

    # bf16 MXU operands everywhere; f32 accumulation + f32 biases inside the kernels.
    xb = x.astype(jnp.bfloat16)                 # stream x in bf16 (dominant operand)
    wq = wq.astype(jnp.bfloat16)
    wk = jnp.asarray(wk, jnp.float32).astype(jnp.bfloat16)
    wv = jnp.asarray(wv, jnp.float32).astype(jnp.bfloat16)
    bq = bq.astype(jnp.float32)
    bk = jnp.asarray(bk, jnp.float32)
    bv = jnp.asarray(bv, jnp.float32)

    tq = next((t for t in (tq_pref, 128) if S % t == 0), S)
    num_q = S // tq
    out_bytes = jnp.dtype(out_dtype).itemsize

    # Fused (K/V cached in VMEM) path whenever the footprint fits this generation;
    # pick the largest Bt that fits (taller MXU LHS, fewer grid steps).
    fused_bt = None
    if not force_flash:
        for bt in range(B, 0, -1):
            if B % bt == 0 and _fused_footprint(bt, S, D, tq, out_bytes) <= budget:
                fused_bt = bt
                break
    if fused_bt is not None:
        return _fused_attention(xb, wq, bq, wk, bk, wv, bv, out_dtype,
                                Bt=fused_bt, tq=tq, num_q=num_q, budget=budget)

    # Flash path: VMEM bounded independent of S (online softmax over KV tiles).
    k, v = _project_kv(xb, wk, bk, wv, bv, budget=budget)
    return _flash_attention(xb, wq, bq, k, v, out_dtype, tq_pref=tq_pref, budget=budget)


def _reference(x, wq, bq, wk, bk, wv, bv):
    D = x.shape[-1]
    q = x @ wq + bq
    k = x @ wk + bk
    v = x @ wv + bv
    scores = jnp.einsum("bsd,btd->bst", q, k) * (D ** -0.5)
    w = jax.nn.softmax(scores, axis=-1)
    return jnp.einsum("bst,btd->bsd", w, v)


if __name__ == "__main__":
    def make_inputs(key, B, S, D):
        kx, kq, kbq, kk, kbk, kv_, kbv = jax.random.split(key, 7)
        bound = 1.0 / (D ** 0.5)
        u = lambda k_, shape: jax.random.uniform(k_, shape, minval=-bound, maxval=bound,
                                                 dtype=jnp.float32)
        x = jax.random.normal(kx, (B, S, D), dtype=jnp.float32)
        return (x, u(kq, (D, D)), u(kbq, (1, D)), u(kk, (D, D)), u(kbk, (1, D)),
                u(kv_, (D, D)), u(kbv, (1, D)))

    key = jax.random.PRNGKey(0)
    k1, k2 = jax.random.split(key)

    # 1) Tiny shape consistent with the module spec (exercises the fused path).
    args = make_inputs(k1, 2, 8, 32)
    out = jax.block_until_ready(attention_block(*args))
    ref = _reference(*args)
    assert out.shape == ref.shape
    err = float(jnp.max(jnp.abs(out - ref)))
    # bf16 MXU operands + approx reciprocal => relaxed tolerance vs f32 reference.
    assert jnp.allclose(out, ref, atol=5e-2, rtol=5e-2), f"fused path mismatch: {err}"

    # 2) Longer sequence: forces the flash (online-softmax, KV-tiled) path.
    args = make_inputs(k2, 2, 1024, 128)
    out = jax.block_until_ready(attention_block(*args, force_flash=True))
    ref = _reference(*args)
    err = float(jnp.max(jnp.abs(out - ref)))
    assert jnp.allclose(out, ref, atol=5e-2, rtol=5e-2), f"flash path mismatch: {err}"

    print("KERNEL_OK")
</pallas_src>

<mosaic_0001>
module attributes {stable_mosaic.version = 11 : i64} {
  func.func @_fused_kernel(%arg0: i32, %arg1: i32, %arg2: memref<2x8x32xbf16, #tpu.memory_space<vmem>>, %arg3: memref<32x32xbf16, #tpu.memory_space<vmem>>, %arg4: memref<1x32xf32, #tpu.memory_space<vmem>>, %arg5: memref<32x32xbf16, #tpu.memory_space<vmem>>, %arg6: memref<1x32xf32, #tpu.memory_space<vmem>>, %arg7: memref<32x32xbf16, #tpu.memory_space<vmem>>, %arg8: memref<1x32xf32, #tpu.memory_space<vmem>>, %arg9: memref<2x8x32xf32, #tpu.memory_space<vmem>>, %arg10: memref<2x8x32xbf16, #tpu.memory_space<vmem>>, %arg11: memref<2x8x32xbf16, #tpu.memory_space<vmem>>) attributes {dimension_semantics = [#tpu.dimension_semantics<parallel>, #tpu.dimension_semantics<arbitrary>], iteration_bounds = array<i64: 1, 1>, scalar_prefetch = 0 : i64, scratch_operands = 2 : i64, tpu.core_type = #tpu.core_type<tc>, window_params = [{transform_indices = @transform_0, window_bounds = array<i64: 2, 8, 32>}, {pipeline_mode = #tpu.pipeline_mode<synchronous>, transform_indices = @transform_1, window_bounds = array<i64: 32, 32>}, {pipeline_mode = #tpu.pipeline_mode<synchronous>, transform_indices = @transform_2, window_bounds = array<i64: 1, 32>}, {pipeline_mode = #tpu.pipeline_mode<synchronous>, transform_indices = @transform_3, window_bounds = array<i64: 32, 32>}, {pipeline_mode = #tpu.pipeline_mode<synchronous>, transform_indices = @transform_4, window_bounds = array<i64: 1, 32>}, {pipeline_mode = #tpu.pipeline_mode<synchronous>, transform_indices = @transform_5, window_bounds = array<i64: 32, 32>}, {pipeline_mode = #tpu.pipeline_mode<synchronous>, transform_indices = @transform_6, window_bounds = array<i64: 1, 32>}, {transform_indices = @transform_7, window_bounds = array<i64: 2, 8, 32>}]} {
    %c0_i32 = arith.constant 0 : i32
    %0 = arith.cmpi eq, %arg1, %c0_i32 : i32
    %1 = arith.extui %0 : i1 to i32
    %c0_i32_0 = arith.constant 0 : i32
    %2 = arith.cmpi ne, %1, %c0_i32_0 : i32
    scf.if %2 {
      %c0_20 = arith.constant 0 : index
      %c0_21 = arith.constant 0 : index
      %c0_22 = arith.constant 0 : index
      %28 = vector.load %arg2[%c0_20, %c0_21, %c0_22] : memref<2x8x32xbf16, #tpu.memory_space<vmem>>, vector<2x8x32xbf16>
      %29 = vector.shape_cast %28 : vector<2x8x32xbf16> to vector<16x32xbf16>
      %c0_23 = arith.constant 0 : index
      %c0_24 = arith.constant 0 : index
      %30 = vector.load %arg5[%c0_23, %c0_24] : memref<32x32xbf16, #tpu.memory_space<vmem>>, vector<32x32xbf16>
      %cst_25 = arith.constant dense<0.000000e+00> : vector<16x32xf32>
      %31 = tpu.matmul %29, %30, %cst_25 {dimension_numbers = #tpu.dot_dimension_numbers<[1], [0], [0], [1], [0, 0, 1, 1], [], []>} : vector<16x32xbf16>, vector<32x32xbf16>, vector<16x32xf32> -> vector<16x32xf32>
      %c0_26 = arith.constant 0 : index
      %c0_27 = arith.constant 0 : index
      %32 = vector.load %arg6[%c0_26, %c0_27] : memref<1x32xf32, #tpu.memory_space<vmem>>, vector<1x32xf32>
      %33 = vector.broadcast %32 : vector<1x32xf32> to vector<16x32xf32>
      %34 = arith.addf %31, %33 : vector<16x32xf32>
      %35 = vector.shape_cast %34 : vector<16x32xf32> to vector<2x8x32xf32>
      %36 = arith.truncf %35 : vector<2x8x32xf32> to vector<2x8x32xbf16>
      %c0_28 = arith.constant 0 : index
      %c0_29 = arith.constant 0 : index
      %c0_30 = arith.constant 0 : index
      %37 = vector.load %arg10[%c0_28, %c0_29, %c0_30] : memref<2x8x32xbf16, #tpu.memory_space<vmem>>, vector<2x8x32xbf16>
      tpu.vector_store %arg10[%c0_28, %c0_29, %c0_30], %36 {strides = array<i32>} : memref<2x8x32xbf16, #tpu.memory_space<vmem>>, vector<2x8x32xbf16>,
      %c0_31 = arith.constant 0 : index
      %c0_32 = arith.constant 0 : index
      %38 = vector.load %arg7[%c0_31, %c0_32] : memref<32x32xbf16, #tpu.memory_space<vmem>>, vector<32x32xbf16>
      %cst_33 = arith.constant dense<0.000000e+00> : vector<16x32xf32>
      %39 = tpu.matmul %29, %38, %cst_33 {dimension_numbers = #tpu.dot_dimension_numbers<[1], [0], [0], [1], [0, 0, 1, 1], [], []>} : vector<16x32xbf16>, vector<32x32xbf16>, vector<16x32xf32> -> vector<16x32xf32>
      %c0_34 = arith.constant 0 : index
      %c0_35 = arith.constant 0 : index
      %40 = vector.load %arg8[%c0_34, %c0_35] : memref<1x32xf32, #tpu.memory_space<vmem>>, vector<1x32xf32>
      %41 = vector.broadcast %40 : vector<1x32xf32> to vector<16x32xf32>
      %42 = arith.addf %39, %41 : vector<16x32xf32>
      %43 = vector.shape_cast %42 : vector<16x32xf32> to vector<2x8x32xf32>
      %44 = arith.truncf %43 : vector<2x8x32xf32> to vector<2x8x32xbf16>
      %c0_36 = arith.constant 0 : index
      %c0_37 = arith.constant 0 : index
      %c0_38 = arith.constant 0 : index
      %45 = vector.load %arg11[%c0_36, %c0_37, %c0_38] : memref<2x8x32xbf16, #tpu.memory_space<vmem>>, vector<2x8x32xbf16>
      tpu.vector_store %arg11[%c0_36, %c0_37, %c0_38], %44 {strides = array<i32>} : memref<2x8x32xbf16, #tpu.memory_space<vmem>>, vector<2x8x32xbf16>,
    } else {
    }
    %c0 = arith.constant 0 : index
    %c0_1 = arith.constant 0 : index
    %c0_2 = arith.constant 0 : index
    %3 = vector.load %arg2[%c0, %c0_1, %c0_2] : memref<2x8x32xbf16, #tpu.memory_space<vmem>>, vector<2x8x32xbf16>
    %4 = vector.shape_cast %3 : vector<2x8x32xbf16> to vector<16x32xbf16>
    %c0_3 = arith.constant 0 : index
    %c0_4 = arith.constant 0 : index
    %5 = vector.load %arg3[%c0_3, %c0_4] : memref<32x32xbf16, #tpu.memory_space<vmem>>, vector<32x32xbf16>
    %cst = arith.constant dense<0.000000e+00> : vector<16x32xf32>
    %6 = tpu.matmul %4, %5, %cst {dimension_numbers = #tpu.dot_dimension_numbers<[1], [0], [0], [1], [0, 0, 1, 1], [], []>} : vector<16x32xbf16>, vector<32x32xbf16>, vector<16x32xf32> -> vector<16x32xf32>
    %c0_5 = arith.constant 0 : index
    %c0_6 = arith.constant 0 : index
    %7 = vector.load %arg4[%c0_5, %c0_6] : memref<1x32xf32, #tpu.memory_space<vmem>>, vector<1x32xf32>
    %8 = vector.broadcast %7 : vector<1x32xf32> to vector<16x32xf32>
    %9 = arith.addf %6, %8 : vector<16x32xf32>
    %10 = vector.shape_cast %9 : vector<16x32xf32> to vector<2x8x32xf32>
    %11 = arith.truncf %10 : vector<2x8x32xf32> to vector<2x8x32xbf16>
    %c0_7 = arith.constant 0 : index
    %c0_8 = arith.constant 0 : index
    %c0_9 = arith.constant 0 : index
    %12 = vector.load %arg10[%c0_7, %c0_8, %c0_9] : memref<2x8x32xbf16, #tpu.memory_space<vmem>>, vector<2x8x32xbf16>
    %c0_10 = arith.constant 0 : index
    %c0_11 = arith.constant 0 : index
    %c0_12 = arith.constant 0 : index
    %13 = vector.load %arg11[%c0_10, %c0_11, %c0_12] : memref<2x8x32xbf16, #tpu.memory_space<vmem>>, vector<2x8x32xbf16>
    %cst_13 = arith.constant dense<0.000000e+00> : vector<2x8x8xf32>
    %14 = tpu.matmul %11, %12, %cst_13 {dimension_numbers = #tpu.dot_dimension_numbers<[2], [2], [1], [1], [0, 0, 0, 1, 1, 1], [0], [0]>} : vector<2x8x32xbf16>, vector<2x8x32xbf16>, vector<2x8x8xf32> -> vector<2x8x8xf32>
    %cst_14 = arith.constant dense<0xFF800000> : vector<2x8xf32>
    %15 = vector.multi_reduction <maximumf>, %14, %cst_14 [2] : vector<2x8x8xf32> to vector<2x8xf32>
    %16 = vector.shape_cast %15 : vector<2x8xf32> to vector<2x8x1xf32>
    %17 = vector.broadcast %16 : vector<2x8x1xf32> to vector<2x8x8xf32>
    %18 = arith.subf %14, %17 : vector<2x8x8xf32>
    %19 = math.exp %18 : vector<2x8x8xf32>
    %cst_15 = arith.constant dense<0.000000e+00> : vector<2x8xf32>
    %20 = vector.multi_reduction <add>, %19, %cst_15 [2] : vector<2x8x8xf32> to vector<2x8xf32>
    %21 = vector.shape_cast %20 : vector<2x8xf32> to vector<2x8x1xf32>
    %22 = tpu.reciprocal %21 {approx = true} : vector<2x8x1xf32> -> vector<2x8x1xf32>
    %23 = vector.broadcast %22 : vector<2x8x1xf32> to vector<2x8x8xf32>
    %24 = arith.mulf %19, %23 : vector<2x8x8xf32>
    %25 = arith.truncf %24 : vector<2x8x8xf32> to vector<2x8x8xbf16>
    %cst_16 = arith.constant dense<0.000000e+00> : vector<2x8x32xf32>
    %26 = tpu.matmul %25, %13, %cst_16 {dimension_numbers = #tpu.dot_dimension_numbers<[2], [1], [1], [2], [0, 0, 0, 1, 1, 2], [0], [0]>} : vector<2x8x8xbf16>, vector<2x8x32xbf16>, vector<2x8x32xf32> -> vector<2x8x32xf32>
    %c0_17 = arith.constant 0 : index
    %c0_18 = arith.constant 0 : index
    %c0_19 = arith.constant 0 : index
    %27 = vector.load %arg9[%c0_17, %c0_18, %c0_19] : memref<2x8x32xf32, #tpu.memory_space<vmem>>, vector<2x8x32xf32>
    tpu.vector_store %arg9[%c0_17, %c0_18, %c0_19], %26 {strides = array<i32>} : memref<2x8x32xf32, #tpu.memory_space<vmem>>, vector<2x8x32xf32>,
    return
  }
  func.func @transform_0(%arg0: i32, %arg1: i32) -> (i32, i32, i32) {
    %c0_i32 = arith.constant 0 : i32
    %c0_i32_0 = arith.constant 0 : i32
    %c0_i32_1 = arith.constant 0 : i32
    return %arg0, %c0_i32, %c0_i32_0 : i32, i32, i32
  }
  func.func @transform_1(%arg0: i32, %arg1: i32) -> (i32, i32) {
    %c0_i32 = arith.constant 0 : i32
    %c0_i32_0 = arith.constant 0 : i32
    %c0_i32_1 = arith.constant 0 : i32
    return %c0_i32, %c0_i32_0 : i32, i32
  }
  func.func @transform_2(%arg0: i32, %arg1: i32) -> (i32, i32) {
    %c0_i32 = arith.constant 0 : i32
    %c0_i32_0 = arith.constant 0 : i32
    %c0_i32_1 = arith.constant 0 : i32
    return %c0_i32, %c0_i32_0 : i32, i32
  }
  func.func @transform_3(%arg0: i32, %arg1: i32) -> (i32, i32) {
    %c0_i32 = arith.constant 0 : i32
    %c0_i32_0 = arith.constant 0 : i32
    %c0_i32_1 = arith.constant 0 : i32
    return %c0_i32, %c0_i32_0 : i32, i32
  }
  func.func @transform_4(%arg0: i32, %arg1: i32) -> (i32, i32) {
    %c0_i32 = arith.constant 0 : i32
    %c0_i32_0 = arith.constant 0 : i32
    %c0_i32_1 = arith.constant 0 : i32
    return %c0_i32, %c0_i32_0 : i32, i32
  }
  func.func @transform_5(%arg0: i32, %arg1: i32) -> (i32, i32) {
    %c0_i32 = arith.constant 0 : i32
    %c0_i32_0 = arith.constant 0 : i32
    %c0_i32_1 = arith.constant 0 : i32
    return %c0_i32, %c0_i32_0 : i32, i32
  }
  func.func @transform_6(%arg0: i32, %arg1: i32) -> (i32, i32) {
    %c0_i32 = arith.constant 0 : i32
    %c0_i32_0 = arith.constant 0 : i32
    %c0_i32_1 = arith.constant 0 : i32
    return %c0_i32, %c0_i32_0 : i32, i32
  }
  func.func @transform_7(%arg0: i32, %arg1: i32) -> (i32, i32, i32) {
    %c0_i32 = arith.constant 0 : i32
    %c0_i32_0 = arith.constant 0 : i32
    return %arg0, %arg1, %c0_i32 : i32, i32, i32
  }
}

</mosaic_0001>

<bundles_post_ra>
// kernel: tpu_custom_call.1
= control target key start
LH: loop header
LB: loop body
LE: loop exit
PB: predicated region body
PF: predicated region fallthrough
CT: control target
= control target key end

     0   :  { %12 = vsyncpa [#allocation5], 0  ;;  %s646_s0 = inlined_call_operand.hbm [shape: bf16[2,8,32], index: 0, kind: input, shape index: {}]   ;;  %s647_s1 = inlined_call_operand.hbm [shape: bf16[32,32], index: 1, kind: input, shape index: {}]   ;;  %s648_s2 = inlined_call_operand.vmem [shape: f32[1,32], index: 2, kind: input, shape index: {}]   ;;  %s649_s3 = inlined_call_operand.hbm [shape: bf16[32,32], index: 3, kind: input, shape index: {}]   ;;  %s650_s4 = inlined_call_operand.vmem [shape: f32[1,32], index: 4, kind: input, shape index: {}]   ;;  %s651_s5 = inlined_call_operand.hbm [shape: bf16[32,32], index: 5, kind: input, shape index: {}]   ;;  %s652_s6 = inlined_call_operand.vmem [shape: f32[1,32], index: 6, kind: input, shape index: {}]   ;;  %s653_s7 = inlined_call_operand.hbm [shape: f32[2,8,32], index: 7, kind: output, shape index: {}]  }
   0x1   :  { %13 = vsyncpa [#allocation8], 0 }
   0x2   :  { %14 = vsyncpa [#allocation11], 0 }
   0x3   :  { %15 = vsyncpa [#allocation6], 0  ;;  %s33_s26 = sshll.u32 %s647_s1, 4  ;;  %s554_s27 = smov [#allocation7]   ;;  %s34_s26 = int_to_ptr.hbm [resolvable:$true] %s33_s26 }
   0x4   :  { %s35_s28 = sshll.u32 %s554_s27, 4  ;;  %s20_s8 = sshll.u32 %s646_s0, 4  ;;  %s36_s28 = int_to_ptr.vmem [resolvable:$true] %s35_s28  ;;  %s21_s8 = int_to_ptr.hbm [resolvable:$true] %s20_s8 }
   0x5   :  { %s555_s9 = smov 64   ;;  %s556_s10 = smov 4  }
   0x6   :  { %41 = dma.hbm_to_vmem [thread:$0]  %s34_s26, 256, %s36_s28, [#allocation8], %s555_s9, %s555_s9, %s556_s10  }
   0x7   :  { %s557_s11 = smov [#allocation4]   ;;  %s48_s15 = sshll.u32 %s649_s3, 4  ;;  %s49_s15 = int_to_ptr.hbm [resolvable:$true] %s48_s15 }
   0x8   :  { %s22_s12 = sshll.u32 %s557_s11, 4  ;;  %s63_s17 = sshll.u32 %s651_s5, 4  ;;  %s23_s12 = int_to_ptr.vmem [resolvable:$true] %s22_s12  ;;  %s64_s17 = int_to_ptr.hbm [resolvable:$true] %s63_s17 }
   0x9   :  { %28 = dma.hbm_to_vmem [thread:$0]  %s21_s8, 128, %s23_s12, [#allocation5], %s555_s9, %s555_s9, %s556_s10  }
   0xa   :  { %s558_s18 = smov [#allocation9]   ;;  %s559_s0 = smov [#allocation10]  }
   0xb   :  { %s50_s19 = sshll.u32 %s558_s18, 4  ;;  %s65_s20 = sshll.u32 %s559_s0, 4  ;;  %s51_s19 = int_to_ptr.vmem [resolvable:$true] %s50_s19  ;;  %s66_s20 = int_to_ptr.vmem [resolvable:$true] %s65_s20 }
   0xc   :  { %56 = dma.hbm_to_vmem [thread:$0]  %s49_s15, 256, %s51_s19, [#allocation8], %s555_s9, %s555_s9, %s556_s10  }
   0xd   :  { %71 = dma.hbm_to_vmem [thread:$0]  %s64_s17, 256, %s66_s20, [#allocation11], %s555_s9, %s555_s9, %s556_s10  }
   0xe   :  { %546 = dma.done.wait [#allocation5], 128  }
   0xf   :  { %547 = vsyncadd [#allocation5], 4294967168 }
  0x10   :  { %548 = dma.done.wait [#allocation8], 512  }
  0x11   :  { %549 = vsyncadd [#allocation8], 4294966784 }
  0x12   :  { %550 = dma.done.wait [#allocation11], 256  }
  0x13   :  { %551 = vsyncadd [#allocation11], 4294967040  ;;  %v400_v0 = vld [vmem:[#allocation9 + $0x8] sm:$0xff]  ;;  %v405_v1 = vld [vmem:[#allocation7 + $0x8] sm:$0xff]  ;;  %vm122_vm0 = vcmask 261120   ;;  %vm142_vm1 = vcmask 257024  }
  0x14   :  { %132 = vmatpush.bf16.msra.mxu0 %v400_v0  ;;  %v399_v2 = vld [vmem:[#allocation9] sm:$0xff]  ;;  %220 = vmatpush.bf16.msra.mxu2 %v405_v1  ;;  %v404_v3 = vld [vmem:[#allocation7] sm:$0xff]  ;;  %v398_v4 = vld [vmem:[#allocation4] sm:$0xff]  ;;  %vm272_vm2 = vcmask 64512   ;;  %vm300_vm3 = vcmask 1043456   ;;  %s344_s26 = sshll.u32 %s653_s7, 4  ;;  %s345_s26 = int_to_ptr.hbm [resolvable:$true] %s344_s26 }
  0x15   :  { %v403_v5 = vld [vmem:[#allocation4] sm:$0xff]  ;;  %v415_v6 = vld [vmem:[%s650_s4] ss:$0 sm:$0xff]  ;;  %v401_v25 = vld [vmem:[#allocation10] sm:$0xff]  ;;  %s561_s27 = smov 128   ;;  %s562_s28 = smov 8  }
  0x16   :  { %v416_v12 = vld [vmem:[%s648_s2] ss:$0 sm:$0xff] }
  0x17   :  { %v402_v24 = vld [vmem:[#allocation10 + $0x8] sm:$0xff] }
  0x18   :  { %133 = vmatpush.bf16.msra.mxu0 %v399_v2  ;;  %221 = vmatpush.bf16.msra.mxu2 %v404_v3  ;;  %v417_v32 = vld [vmem:[%s652_s6] ss:$0 sm:$0xff]  ;;  %s560_s6 = smov [#allocation12]  }
  0x19   :  { %171 = vmatpush.bf16.msra.mxu1 %v402_v24  ;;  %s342_s23 = sshll.u32 %s560_s6, 4  ;;  %s343_s23 = int_to_ptr.vmem [resolvable:$true] %s342_s23 }
  0x1b   :  { %371 = vmatmul.msk.bf16.vlgmr.msra.gmra.mxu0 %vm122_vm0, %v398_v4  ;;  %393 = vmatmul.msk.bf16.vlgmr.msra.gmra.mxu2 %vm122_vm0, %v403_v5 }
  0x1d   :  { %172 = vmatpush.bf16.msra.mxu1 %v401_v25 }
  0x20   :  { %380 = vmatmul.msk.bf16.vlgmr.msra.gmra.mxu1 %vm122_vm0, %v398_v4 }
  0x98   :  { %v135_v7 = vpop.f32.mrf.mxu0 }
  0x99   :  { %v136_v8 = vadd.f32 %v415_v6, %v135_v7 }
  0x9b   :  { %v140_v9 = vpack.c.bf16 %v136_v8, %v136_v8 }
  0x9d   :  { %143 = vst.msk [vmem:[#allocation2] sm:$0xf] %vm142_vm1, %v140_v9  ;;  %v174_v33 = vpop.f32.mrf.mxu1 }
  0x9e   :  { %v223_v13 = vpop.f32.mrf.mxu2  ;;  %v175_v34 = vadd.f32 %v417_v32, %v174_v33 }
  0x9f   :  { %v224_v17 = vadd.f32 %v416_v12, %v223_v13 }
  0xa0   :  { %v137_v10 = vpop.f32.mrf.mxu0  ;;  %v179_v35 = vpack.c.bf16 %v175_v34, %v175_v34 }
  0xa1   :  { %v138_v11 = vadd.f32 %v415_v6, %v137_v10  ;;  %v228_v18 = vpack.c.bf16 %v224_v17, %v224_v17 }
  0xa2   :  { %181 = vst.msk [vmem:[#allocation3] sm:$0xf] %vm142_vm1, %v179_v35 }
  0xa3   :  { %v141_v14 = vpack.c.bf16 %v138_v11, %v138_v11 }
  0xa4   :  { %v230_v15 = vld [vmem:[#allocation2] sm:$0xf] }
  0xa5   :  { %144 = vst.msk [vmem:[#allocation2 + $0x4] sm:$0xf] %vm142_vm1, %v141_v14  ;;  %v238_v16 = vsel %vm122_vm0, %v230_v15, 0  ;;  %v176_v39 = vpop.f32.mrf.mxu1 }
  0xa6   :  { %247 = vmatpush.bf16.xpose.msra.mxu3 %v238_v16  ;;  %v225_v20 = vpop.f32.mrf.mxu2  ;;  %v177_v40 = vadd.f32 %v417_v32, %v176_v39 }
  0xa7   :  { %v226_v22 = vadd.f32 %v416_v12, %v225_v20 }
  0xa8   :  { %v180_v41 = vpack.c.bf16 %v177_v40, %v177_v40 }
  0xa9   :  { %v229_v23 = vpack.c.bf16 %v226_v22, %v226_v22  ;;  %v232_v42 = vld [vmem:[#allocation3] sm:$0xf] }
  0xaa   :  { %182 = vst.msk [vmem:[#allocation3 + $0x4] sm:$0xf] %vm142_vm1, %v180_v41  ;;  %v302_v44 = vsel %vm300_vm3, %v232_v42, 0 }
  0xab   :  { %311 = vmatpush.bf16.msrb.mxu1 %v302_v44 }
  0xac   :  { %v231_v19 = vld [vmem:[#allocation2 + $0x4] sm:$0xf] }
  0xad   :  { %394 = vmatmul.msk.bf16.vlgmr.msra.gmra.mxu3 %vm122_vm0, %v228_v18  ;;  %v257_v21 = vsel %vm122_vm0, %v231_v19, 0 }
  0xae   :  { %266 = vmatpush.bf16.xpose.msrb.mxu0 %v257_v21 }
  0xb1   :  { %v233_v49 = vld [vmem:[#allocation3 + $0x4] sm:$0xf] }
  0xb2   :  { %v321_v50 = vsel %vm300_vm3, %v233_v49, 0 }
  0xb3   :  { %330 = vmatpush.bf16.msrb.mxu2 %v321_v50 }
  0xb5   :  { %395 = vmatmul.msk.bf16.vlgmr.msrb.gmra.mxu0 %vm122_vm0, %v229_v23 }
 0x130   :  { %v249_v26 = vpop.f32.mrf.mxu3 }
 0x131   :  { %v273_v31 = vsel %vm272_vm2, %v249_v26, -inf }
 0x132   :  { %v268_v27 = vpop.f32.mrf.mxu0 }
 0x133   :  { %v276_v28 = vsel %vm272_vm2, %v268_v27, -inf }
 0x134   :  { %277 = vmax.xlane.f32.xlu0 %v276_v28 }
 0x138   :  { %v251_v29 = vpop.f32.mrf.mxu3 }
 0x13a   :  { %v270_v30 = vpop.f32.mrf.mxu0 }
 0x13c   :  { %274 = vmax.xlane.f32.xlu0 %v273_v31 }
 0x1a7   :  { %v278_v36 = vpop.xlane.xlu0 %277 }
 0x1a8   :  { %v280_v37 = vsub.f32 %v268_v27, %v278_v36 }
 0x1aa   :  { %v283_v38 = vmul.f32 1.442695, %v280_v37 }
 0x1ac   :  { %418 = vpow2.f32 %v283_v38 }
 0x1af   :  { %v275_v43 = vpop.xlane.xlu0 %274 }
 0x1b0   :  { %v279_v45 = vsub.f32 %v249_v26, %v275_v43 }
 0x1b2   :  { %v419_v46 = vpop.eup %418  ;;  %v281_v47 = vmul.f32 1.442695, %v279_v45 }
 0x1b3   :  { %v288_v48 = vsel %vm272_vm2, %v419_v46, 0.0 }
 0x1b4   :  { %420 = vpow2.f32 %v281_v47  ;;  %289 = vadd.xlane.f32.xlu1 %v288_v48 }
 0x1ba   :  { %v421_v51 = vpop.eup %420 }
 0x1bb   :  { %v285_v52 = vsel %vm272_vm2, %v421_v51, 0.0 }
 0x1bc   :  { %286 = vadd.xlane.f32.xlu1 %v285_v52 }
 0x227   :  { %v290_v53 = vpop.xlane.xlu1 %289 }
 0x228   :  { %422 = vrcp.f32 %v290_v53 }
 0x22e   :  { %v423_v54 = vpop.eup %422 }
 0x22f   :  { %v294_v55 = vmul.f32 %v423_v54, %v419_v46  ;;  %v287_v56 = vpop.xlane.xlu1 %286 }
 0x230   :  { %424 = vrcp.f32 %v287_v56 }
 0x231   :  { %v296_v57 = vpack.c.bf16 %v294_v55, %v294_v55 }
 0x233   :  { %397 = vmatmul.msk.bf16.vlgmr.msrb.gmra.mxu2 %vm272_vm2, %v296_v57 }
 0x236   :  { %v425_v58 = vpop.eup %424 }
 0x237   :  { %v293_v59 = vmul.f32 %v425_v58, %v421_v51 }
 0x239   :  { %v295_v60 = vpack.c.bf16 %v293_v59, %v293_v59 }
 0x23b   :  { %396 = vmatmul.msk.bf16.vlgmr.msrb.gmra.mxu1 %vm272_vm2, %v295_v60 }
 0x2b6   :  { %v332_v61 = vpop.f32.mrf.mxu2 }
 0x2b7   :  { %337 = vst.msk [vmem:[#allocation12 + $0x8] sm:$0xff] %vm122_vm0, %v332_v61 }
 0x2b8   :  { %v313_v62 = vpop.f32.mrf.mxu1 }
 0x2b9   :  { %336 = vst.msk [vmem:[#allocation12] sm:$0xff] %vm122_vm0, %v313_v62 }
 0x2ba   :  { %350 = dma.vmem_to_hbm [thread:$0]  %s343_s23, 256, %s345_s26, [#allocation6], %s561_s27, %s561_s27, %s562_s28  }
 0x2be   :  { %v334_v63 = vpop.f32.mrf.mxu2 }
 0x2c0   :  { %v315_v0 = vpop.f32.mrf.mxu1 }
 0x2c1   :  { %552 = dma.done.wait [#allocation6], 256  }
 0x2c2   :  { %553 = vsyncadd [#allocation6], 4294967040 }
 0x2c3   :  { %355 = vsyncpa [#allocation5], 1 }
 0x2c4   :  { %356 = vsyncpa [#allocation8], 1 }
 0x2c5   :  { %357 = vsyncpa [#allocation11], 1 }
 0x2c6   :  { %358 = vsyncpa [#allocation6], 1 }

</bundles_post_ra>
